<compile_context>
chip_gen: v5e
topology: v5e:2x2
jax: 0.10.0
libtpu: 0.0.40
codegen_flags: <defaults>
</compile_context>

<pallas_src>
import functools

import jax
import jax.numpy as jnp
from jax.experimental import pallas as pl
from jax.experimental.pallas import tpu as pltpu

# ----- Baseline_CNNConfig equivalent (using_pretrained = False) -----
VOCAB_SIZE = 100
EMBEDDING_SIZE = 32          # word_dim == embedding_size (no pretrained concat)
CHANNEL_SIZE = [32, 32, 32]  # conv out-channels (all convs read word_dim in forward)
KERNEL_SIZE = [3, 4, 5]
LABELS_NUM = 4

BATCH = 2
SEQ = 16

C_PAD = 128                  # lane-packed channel width (sum(CHANNEL_SIZE)=96 -> 128)
V_PAD = 128                  # vocab padded to an MXU-native 128 contraction dim
L_PAD = 8                    # FC output lanes (labels=4 -> 8); trims w_fc DMA 16x


def _fused_kernel(ids_ref, emb_tab_ref, w_taps_ref, b_all_ref, vlen_ref,
                  w_fc_ref, b_fc_ref, out_ref, *, batch, seq):
    """Embedding + all convs + ReLU + masked max-pool + FC for the whole batch.

    ids_ref   : (kmax*B*S, 1) int32    tap-shifted token ids (-1 = zero sentinel)
    emb_tab   : (V_PAD, E)     bf16    vocab-padded embedding table
    w_taps    : (kmax, E, C_PAD) bf16  channel-packed conv weights, one slab/tap
    b_all     : (1, C_PAD)     f32     packed conv biases
    vlen      : (1, C_PAD)     int32   valid conv output length per channel
    w_fc      : (C_PAD, L_PAD) f32     FC weight (outputs padded 4 -> 8 lanes)
    b_fc      : (1, L_PAD)     f32     FC bias
    out_ref   : (B, L_PAD)     f32     padded logits
    """
    kmax, _, c_pad = w_taps_ref.shape
    v_pad = emb_tab_ref.shape[0]
    bs = batch * seq

    # ---- fused embedding lookup for ALL kmax tap views in one MXU matmul ----
    # one-hot(ids) @ table is exact; -1 sentinels give exact zero rows.  (Note:
    # ids outside [0, V) map to a zero embedding; torch nn.Embedding would raise.)
    ids = ids_ref[...]                                              # (kmax*bs, 1)
    onehot = (ids == jax.lax.broadcasted_iota(
        jnp.int32, (kmax * bs, v_pad), 1)).astype(jnp.float32)
    emb_all = jnp.dot(onehot.astype(emb_tab_ref.dtype), emb_tab_ref[...],
                      preferred_element_type=jnp.float32)           # (kmax*bs, E)
    # TODO(synk): nn.Dropout(0.5) is identity at inference; no train-mode RNG here.

    # ---- all convs as per-tap MXU accumulation (no lane concat, no misaligned
    # sublane shifts: slices start at multiples of bs=32).  emb values are
    # bf16-exact (they are rows of the bf16 table), so the cast is lossless.
    y = jnp.zeros((bs, c_pad), jnp.float32)
    for k in range(kmax):                                           # static unroll
        emb_k = emb_all[k * bs:(k + 1) * bs, :].astype(w_taps_ref.dtype)
        y = y + jnp.dot(emb_k, w_taps_ref[k],
                        preferred_element_type=jnp.float32)
    y = jnp.maximum(y + b_all_ref[...], 0.0)                        # (bs, c_pad)

    # ---- batched masked AdaptiveMaxPool1d(1) + FC (one matmul, one store) ----
    # Invariants the mask relies on (asserted here for future refactors):
    #  (1) ReLU output >= 0, so zero-filled masked positions never win the max;
    #  (2) tail positions t >= seq-k+1 (which read the next row's tokens or the
    #      -1 sentinels) are exactly the positions masked out by vlen.
    pos = jax.lax.broadcasted_iota(jnp.int32, (batch, seq, c_pad), 1)
    valid = pos < vlen_ref[...]                                     # (B, S, c_pad)
    feat = jnp.max(jnp.where(valid, y.reshape(batch, seq, c_pad), 0.0),
                   axis=1)                                          # (B, c_pad)
    logits = jnp.dot(feat, w_fc_ref[...],
                     preferred_element_type=jnp.float32) + b_fc_ref[...]
    out_ref[...] = logits.astype(out_ref.dtype)                     # one store


def pack_params(emb_table, conv_ws, conv_bs, w_fc, b_fc, *, seq,
                c_pad=C_PAD, v_pad=V_PAD, l_pad=L_PAD):
    """One-time packing of module params into the kernel's lane-dense layout."""
    v, e = emb_table.shape
    kmax = max(int(w.shape[0]) for w in conv_ws)
    c_tot = sum(int(w.shape[2]) for w in conv_ws)
    labels = w_fc.shape[1]

    # Vocab padded to 128 rows (zeros) -> clean 128-wide MXU contraction; bf16
    # storage is exact under the one-hot gather (each output row = one table row).
    emb_pad = jnp.zeros((v_pad, e), jnp.float32).at[:v].set(emb_table)
    emb_pad = emb_pad.astype(jnp.bfloat16)

    # Channel-packed conv weights: one (E, C_PAD) slab per tap k (zero slabs for
    # taps a conv does not have); biases and valid output lengths packed likewise.
    w_taps = jnp.zeros((kmax, e, c_pad), jnp.float32)
    b_all = jnp.zeros((1, c_pad), jnp.float32)
    vlen = jnp.zeros((1, c_pad), jnp.int32)
    off = 0
    for w, b in zip(conv_ws, conv_bs):
        k, _, c = w.shape
        w_taps = w_taps.at[:k, :, off:off + c].set(w)
        b_all = b_all.at[:, off:off + c].set(b)
        vlen = vlen.at[:, off:off + c].set(seq - k + 1)
        off += c
    w_taps = w_taps.astype(jnp.bfloat16)     # halves the dominant weight DMA (v5e)

    w_fc_pad = jnp.zeros((c_pad, l_pad), jnp.float32).at[:c_tot, :labels].set(w_fc)
    b_fc_pad = jnp.zeros((1, l_pad), jnp.float32).at[:, :labels].set(b_fc)
    return emb_pad, w_taps, b_all, vlen, w_fc_pad, b_fc_pad


@functools.partial(jax.jit, static_argnames=("labels",))
def cnn_classifier_forward(token_ids, emb_pad, w_taps, b_all, vlen,
                           w_fc_pad, b_fc_pad, *, labels):
    """token_ids: (B, S) int32.  Returns logits (B, labels)."""
    batch, seq = token_ids.shape
    kmax = w_taps.shape[0]
    l_pad = w_fc_pad.shape[1]
    bs = batch * seq

    # Build the kmax tap-shifted views of the flat token stream OUTSIDE the kernel
    # (tiny int32 XLA work) so the kernel never slices at misaligned sublane
    # offsets.  -1 sentinels -> exact zero embedding rows.
    ids_flat = token_ids.reshape(bs).astype(jnp.int32)
    ids_sent = jnp.concatenate([ids_flat, jnp.full((kmax - 1,), -1, jnp.int32)])
    ids_taps = jnp.stack([ids_sent[k:k + bs] for k in range(kmax)])   # (kmax, bs)
    ids_taps = ids_taps.reshape(kmax * bs, 1)

    operands = (ids_taps, emb_pad, w_taps, b_all, vlen, w_fc_pad, b_fc_pad)

    # No grid: one invocation, whole-array VMEM operands -> no double-buffering,
    # no pipeline prologue/epilogue for a grid of 1.
    # TODO(synk): if BATCH/SEQ/VOCAB scale up, add a leading "parallel" batch grid
    # axis (v7x: 2 TensorCores, 64 MiB VMEM) and re-derive intermediate sizes; at
    # serving time amortize weight DMA by batching many sequences per call.
    logits_pad = pl.pallas_call(
        functools.partial(_fused_kernel, batch=batch, seq=seq),
        out_shape=jax.ShapeDtypeStruct((batch, l_pad), jnp.float32),
        in_specs=[pl.BlockSpec(memory_space=pltpu.MemorySpace.VMEM)
                  for _ in operands],
        out_specs=pl.BlockSpec(memory_space=pltpu.MemorySpace.VMEM),
    )(*operands)
    return logits_pad[:, :labels]


def _reference(token_ids, emb_table, conv_ws, conv_bs, w_fc, b_fc):
    """Pure-JAX f32 reference matching the torch forward (eval mode)."""
    hp = jax.lax.Precision.HIGHEST
    emb = emb_table[token_ids]                        # (B, S, E)
    feats = []
    for w, bias in zip(conv_ws, conv_bs):
        ksz = w.shape[0]
        out_len = emb.shape[1] - ksz + 1
        acc = jnp.zeros((emb.shape[0], out_len, w.shape[2]), jnp.float32)
        for k in range(ksz):
            acc += jnp.einsum("ble,ec->blc", emb[:, k:k + out_len, :], w[k],
                              precision=hp)
        acc = jax.nn.relu(acc + bias[None])
        feats.append(jnp.max(acc, axis=1))
    feat = jnp.concatenate(feats, axis=1)
    return jnp.dot(feat, w_fc, precision=hp) + b_fc


if __name__ == "__main__":
    key = jax.random.PRNGKey(0)
    k_tok, k_emb, k_fc, *k_convs = jax.random.split(key, 3 + len(KERNEL_SIZE))

    token_ids = jax.random.randint(k_tok, (BATCH, SEQ), 0, VOCAB_SIZE,
                                   dtype=jnp.int32)

    # Deterministic parameter init (shapes follow the module __init__).
    emb_table = jax.random.normal(k_emb, (VOCAB_SIZE, EMBEDDING_SIZE), jnp.float32)

    conv_ws, conv_bs = [], []
    in_ch = EMBEDDING_SIZE
    for i, (ksz, out_ch) in enumerate(zip(KERNEL_SIZE, CHANNEL_SIZE)):
        kw, kb = jax.random.split(k_convs[i])
        scale = 1.0 / jnp.sqrt(in_ch * ksz)
        conv_ws.append(scale * jax.random.normal(kw, (ksz, in_ch, out_ch),
                                                 jnp.float32))
        conv_bs.append(scale * jax.random.normal(kb, (1, out_ch), jnp.float32))

    # fc params ~ N(0, 0.01) as in init.normal_(params, mean=0, std=0.01)
    w_fc = 0.01 * jax.random.normal(k_fc, (sum(CHANNEL_SIZE), LABELS_NUM),
                                    jnp.float32)
    b_fc = 0.01 * jax.random.normal(jax.random.fold_in(k_fc, 1), (1, LABELS_NUM),
                                    jnp.float32)

    # One-time parameter packing into the kernel's lane-dense layout.
    emb_pad, w_taps, b_all, vlen, w_fc_pad, b_fc_pad = pack_params(
        emb_table, conv_ws, conv_bs, w_fc, b_fc, seq=SEQ)

    logits = jax.block_until_ready(
        cnn_classifier_forward(token_ids, emb_pad, w_taps, b_all, vlen,
                               w_fc_pad, b_fc_pad, labels=LABELS_NUM))

    # Structural check: reference using the SAME bf16-quantized table/conv weights
    # the kernel consumes (kernel matmuls are exact for bf16 inputs with f32
    # accumulation, so only accumulation-order noise remains).
    q = lambda a: a.astype(jnp.bfloat16).astype(jnp.float32)
    ref_q = _reference(token_ids, q(emb_table), [q(w) for w in conv_ws],
                       conv_bs, w_fc, b_fc)
    # Fidelity check vs full-f32 torch semantics: bf16 weight storage (perf
    # review, v5e DMA) drifts logits by a few 1e-4; allow a 2e-3 envelope.
    ref_f32 = _reference(token_ids, emb_table, conv_ws, conv_bs, w_fc, b_fc)

    assert logits.shape == (BATCH, LABELS_NUM)
    assert jnp.allclose(logits, ref_q, atol=1e-3, rtol=1e-3), \
        "mismatch vs bf16-weight JAX reference"
    assert jnp.allclose(logits, ref_f32, atol=2e-3, rtol=2e-3), \
        "mismatch vs f32 JAX reference"

    print("KERNEL_OK")
</pallas_src>

<mosaic_0001>
module attributes {stable_mosaic.version = 11 : i64} {
  func.func @_fused_kernel(%arg0: memref<160x1xi32, #tpu.memory_space<vmem>>, %arg1: memref<128x32xbf16, #tpu.memory_space<vmem>>, %arg2: memref<5x32x128xbf16, #tpu.memory_space<vmem>>, %arg3: memref<1x128xf32, #tpu.memory_space<vmem>>, %arg4: memref<1x128xi32, #tpu.memory_space<vmem>>, %arg5: memref<128x8xf32, #tpu.memory_space<vmem>>, %arg6: memref<1x8xf32, #tpu.memory_space<vmem>>, %arg7: memref<2x8xf32, #tpu.memory_space<vmem>>) attributes {dimension_semantics = [], scalar_prefetch = 0 : i64, scratch_operands = 0 : i64, tpu.core_type = #tpu.core_type<tc>} {
    %c0 = arith.constant 0 : index
    %c0_0 = arith.constant 0 : index
    %0 = vector.load %arg0[%c0, %c0_0] : memref<160x1xi32, #tpu.memory_space<vmem>>, vector<160x1xi32>
    %1 = tpu.iota {dimensions = array<i32: 1>} : vector<160x128xi32>
    %2 = vector.broadcast %0 : vector<160x1xi32> to vector<160x128xi32>
    %3 = arith.cmpi eq, %2, %1 : vector<160x128xi32>
    %4 = arith.extui %3 : vector<160x128xi1> to vector<160x128xi32>
    %5 = arith.sitofp %4 : vector<160x128xi32> to vector<160x128xf32>
    %6 = arith.truncf %5 : vector<160x128xf32> to vector<160x128xbf16>
    %c0_1 = arith.constant 0 : index
    %c0_2 = arith.constant 0 : index
    %7 = vector.load %arg1[%c0_1, %c0_2] : memref<128x32xbf16, #tpu.memory_space<vmem>>, vector<128x32xbf16>
    %cst = arith.constant dense<0.000000e+00> : vector<160x32xf32>
    %8 = tpu.matmul %6, %7, %cst {dimension_numbers = #tpu.dot_dimension_numbers<[1], [0], [0], [1], [0, 0, 1, 1], [], []>} : vector<160x128xbf16>, vector<128x32xbf16>, vector<160x32xf32> -> vector<160x32xf32>
    %cst_3 = arith.constant 0.000000e+00 : f32
    %9 = vector.broadcast %cst_3 : f32 to vector<32x128xf32>
    %10 = vector.extract_strided_slice %8 {offsets = [0, 0], sizes = [32, 32], strides = [1, 1]} : vector<160x32xf32> to vector<32x32xf32>
    %11 = arith.truncf %10 : vector<32x32xf32> to vector<32x32xbf16>
    %c0_4 = arith.constant 0 : index
    %c0_5 = arith.constant 0 : index
    %c0_6 = arith.constant 0 : index
    %12 = vector.load %arg2[%c0_4, %c0_5, %c0_6] : memref<5x32x128xbf16, #tpu.memory_space<vmem>>, vector<1x32x128xbf16>
    %13 = vector.shape_cast %12 : vector<1x32x128xbf16> to vector<32x128xbf16>
    %cst_7 = arith.constant dense<0.000000e+00> : vector<32x128xf32>
    %14 = tpu.matmul %11, %13, %cst_7 {dimension_numbers = #tpu.dot_dimension_numbers<[1], [0], [0], [1], [0, 0, 1, 1], [], []>} : vector<32x32xbf16>, vector<32x128xbf16>, vector<32x128xf32> -> vector<32x128xf32>
    %15 = arith.addf %9, %14 : vector<32x128xf32>
    %16 = vector.extract_strided_slice %8 {offsets = [32, 0], sizes = [32, 32], strides = [1, 1]} : vector<160x32xf32> to vector<32x32xf32>
    %17 = arith.truncf %16 : vector<32x32xf32> to vector<32x32xbf16>
    %c1 = arith.constant 1 : index
    %c0_8 = arith.constant 0 : index
    %c0_9 = arith.constant 0 : index
    %18 = vector.load %arg2[%c1, %c0_8, %c0_9] : memref<5x32x128xbf16, #tpu.memory_space<vmem>>, vector<1x32x128xbf16>
    %19 = vector.shape_cast %18 : vector<1x32x128xbf16> to vector<32x128xbf16>
    %cst_10 = arith.constant dense<0.000000e+00> : vector<32x128xf32>
    %20 = tpu.matmul %17, %19, %cst_10 {dimension_numbers = #tpu.dot_dimension_numbers<[1], [0], [0], [1], [0, 0, 1, 1], [], []>} : vector<32x32xbf16>, vector<32x128xbf16>, vector<32x128xf32> -> vector<32x128xf32>
    %21 = arith.addf %15, %20 : vector<32x128xf32>
    %22 = vector.extract_strided_slice %8 {offsets = [64, 0], sizes = [32, 32], strides = [1, 1]} : vector<160x32xf32> to vector<32x32xf32>
    %23 = arith.truncf %22 : vector<32x32xf32> to vector<32x32xbf16>
    %c2 = arith.constant 2 : index
    %c0_11 = arith.constant 0 : index
    %c0_12 = arith.constant 0 : index
    %24 = vector.load %arg2[%c2, %c0_11, %c0_12] : memref<5x32x128xbf16, #tpu.memory_space<vmem>>, vector<1x32x128xbf16>
    %25 = vector.shape_cast %24 : vector<1x32x128xbf16> to vector<32x128xbf16>
    %cst_13 = arith.constant dense<0.000000e+00> : vector<32x128xf32>
    %26 = tpu.matmul %23, %25, %cst_13 {dimension_numbers = #tpu.dot_dimension_numbers<[1], [0], [0], [1], [0, 0, 1, 1], [], []>} : vector<32x32xbf16>, vector<32x128xbf16>, vector<32x128xf32> -> vector<32x128xf32>
    %27 = arith.addf %21, %26 : vector<32x128xf32>
    %28 = vector.extract_strided_slice %8 {offsets = [96, 0], sizes = [32, 32], strides = [1, 1]} : vector<160x32xf32> to vector<32x32xf32>
    %29 = arith.truncf %28 : vector<32x32xf32> to vector<32x32xbf16>
    %c3 = arith.constant 3 : index
    %c0_14 = arith.constant 0 : index
    %c0_15 = arith.constant 0 : index
    %30 = vector.load %arg2[%c3, %c0_14, %c0_15] : memref<5x32x128xbf16, #tpu.memory_space<vmem>>, vector<1x32x128xbf16>
    %31 = vector.shape_cast %30 : vector<1x32x128xbf16> to vector<32x128xbf16>
    %cst_16 = arith.constant dense<0.000000e+00> : vector<32x128xf32>
    %32 = tpu.matmul %29, %31, %cst_16 {dimension_numbers = #tpu.dot_dimension_numbers<[1], [0], [0], [1], [0, 0, 1, 1], [], []>} : vector<32x32xbf16>, vector<32x128xbf16>, vector<32x128xf32> -> vector<32x128xf32>
    %33 = arith.addf %27, %32 : vector<32x128xf32>
    %34 = vector.extract_strided_slice %8 {offsets = [128, 0], sizes = [32, 32], strides = [1, 1]} : vector<160x32xf32> to vector<32x32xf32>
    %35 = arith.truncf %34 : vector<32x32xf32> to vector<32x32xbf16>
    %c4 = arith.constant 4 : index
    %c0_17 = arith.constant 0 : index
    %c0_18 = arith.constant 0 : index
    %36 = vector.load %arg2[%c4, %c0_17, %c0_18] : memref<5x32x128xbf16, #tpu.memory_space<vmem>>, vector<1x32x128xbf16>
    %37 = vector.shape_cast %36 : vector<1x32x128xbf16> to vector<32x128xbf16>
    %cst_19 = arith.constant dense<0.000000e+00> : vector<32x128xf32>
    %38 = tpu.matmul %35, %37, %cst_19 {dimension_numbers = #tpu.dot_dimension_numbers<[1], [0], [0], [1], [0, 0, 1, 1], [], []>} : vector<32x32xbf16>, vector<32x128xbf16>, vector<32x128xf32> -> vector<32x128xf32>
    %39 = arith.addf %33, %38 : vector<32x128xf32>
    %c0_20 = arith.constant 0 : index
    %c0_21 = arith.constant 0 : index
    %40 = vector.load %arg3[%c0_20, %c0_21] : memref<1x128xf32, #tpu.memory_space<vmem>>, vector<1x128xf32>
    %41 = vector.broadcast %40 : vector<1x128xf32> to vector<32x128xf32>
    %42 = arith.addf %39, %41 : vector<32x128xf32>
    %cst_22 = arith.constant 0.000000e+00 : f32
    %43 = vector.broadcast %cst_22 : f32 to vector<32x128xf32>
    %44 = arith.maximumf %42, %43 : vector<32x128xf32>
    %45 = tpu.iota {dimensions = array<i32: 1>} : vector<2x16x128xi32>
    %c0_23 = arith.constant 0 : index
    %c0_24 = arith.constant 0 : index
    %46 = vector.load %arg4[%c0_23, %c0_24] : memref<1x128xi32, #tpu.memory_space<vmem>>, vector<1x128xi32>
    %47 = vector.shape_cast %46 : vector<1x128xi32> to vector<1x1x128xi32>
    %48 = vector.broadcast %47 : vector<1x1x128xi32> to vector<2x16x128xi32>
    %49 = arith.cmpi slt, %45, %48 : vector<2x16x128xi32>
    %50 = vector.shape_cast %44 : vector<32x128xf32> to vector<2x16x128xf32>
    %cst_25 = arith.constant 0.000000e+00 : f32
    %51 = vector.broadcast %cst_25 : f32 to vector<2x16x128xf32>
    %52 = arith.select %49, %50, %51 : vector<2x16x128xi1>, vector<2x16x128xf32>
    %cst_26 = arith.constant dense<0xFF800000> : vector<2x128xf32>
    %53 = vector.multi_reduction <maximumf>, %52, %cst_26 [1] : vector<2x16x128xf32> to vector<2x128xf32>
    %c0_27 = arith.constant 0 : index
    %c0_28 = arith.constant 0 : index
    %54 = vector.load %arg5[%c0_27, %c0_28] : memref<128x8xf32, #tpu.memory_space<vmem>>, vector<128x8xf32>
    %cst_29 = arith.constant dense<0.000000e+00> : vector<2x8xf32>
    %55 = tpu.matmul %53, %54, %cst_29 {dimension_numbers = #tpu.dot_dimension_numbers<[1], [0], [0], [1], [0, 0, 1, 1], [], []>} : vector<2x128xf32>, vector<128x8xf32>, vector<2x8xf32> -> vector<2x8xf32>
    %c0_30 = arith.constant 0 : index
    %c0_31 = arith.constant 0 : index
    %56 = vector.load %arg6[%c0_30, %c0_31] : memref<1x8xf32, #tpu.memory_space<vmem>>, vector<1x8xf32>
    %57 = vector.broadcast %56 : vector<1x8xf32> to vector<2x8xf32>
    %58 = arith.addf %55, %57 : vector<2x8xf32>
    %c0_32 = arith.constant 0 : index
    %c0_33 = arith.constant 0 : index
    %59 = vector.load %arg7[%c0_32, %c0_33] : memref<2x8xf32, #tpu.memory_space<vmem>>, vector<2x8xf32>
    tpu.vector_store %arg7[%c0_32, %c0_33], %58 {strides = array<i32>} : memref<2x8xf32, #tpu.memory_space<vmem>>, vector<2x8xf32>,
    return
  }
}

</mosaic_0001>

<bundles_post_ra>
// kernel: cnn_classifier_forward.1
= control target key start
LH: loop header
LB: loop body
LE: loop exit
PB: predicated region body
PF: predicated region fallthrough
CT: control target
= control target key end

     0   :  { %v834_v2 = vmov 0   ;;  %s1070_s0 = inlined_call_operand.vmem [shape: s32[160,1], index: 0, kind: input, shape index: {}]   ;;  %s1071_s1 = inlined_call_operand.vmem [shape: bf16[128,32], index: 1, kind: input, shape index: {}]   ;;  %s1072_s2 = inlined_call_operand.vmem [shape: bf16[5,32,128], index: 2, kind: input, shape index: {}]   ;;  %s1073_s3 = inlined_call_operand.vmem [shape: f32[1,128], index: 3, kind: input, shape index: {}]   ;;  %s1074_s4 = inlined_call_operand.vmem [shape: s32[1,128], index: 4, kind: input, shape index: {}]   ;;  %s1075_s5 = inlined_call_operand.vmem [shape: f32[128,8], index: 5, kind: input, shape index: {}]   ;;  %s1076_s6 = inlined_call_operand.vmem [shape: f32[1,8], index: 6, kind: input, shape index: {}]   ;;  %s1077_s7 = inlined_call_operand.hbm [shape: f32[2,8], index: 7, kind: output, shape index: {}]  }
   0x1   :  { %v30_v0 = vld [vmem:[%s1070_s0 + $0x10] sm:$0xff]  ;;  %v28_v1 = vld [vmem:[%s1070_s0] sm:$0xff]  ;;  %803 = vset.pattern.permute.xlu1 %v834_v2  ;;  %802 = vset.pattern.permute.xlu0 %v834_v2 }
   0x2   :  { %v32_v3 = vld [vmem:[%s1070_s0 + $0x20] sm:$0xff]  ;;  %57 = vperm.xlu1 %803, %v30_v0   ;;  %51 = vperm.xlu0 %802, %v28_v1  }
   0x3   :  { %804 = vset.pattern.permute.xlu2 %v834_v2 }
   0x4   :  { %63 = vperm.xlu2 %804, %v32_v3  }
   0x5   :  { %12 = vsyncpa [#allocation3], 0  ;;  %v31_v4 = vld [vmem:[%s1070_s0 + $0x18] sm:$0xff]  ;;  %v29_v5 = vld [vmem:[%s1070_s0 + $0x8] sm:$0xff]  ;;  %v48_v32 = vlaneseq  ;;  %v835_v37 = vmov 1.0|1.0  }
   0x6   :  { %v33_v6 = vld [vmem:[%s1070_s0 + $0x28] sm:$0xff]  ;;  %v39_v7 = vld [vmem:[%s1070_s0 + $0x58] sm:$0xff]  ;;  %v38_v8 = vld [vmem:[%s1070_s0 + $0x50] sm:$0xff]  ;;  %s836_s12 = smov [#allocation2]   ;;  %s626_s16 = sshll.u32 %s1077_s7, 4  ;;  %s627_s16 = int_to_ptr.hbm [resolvable:$true] %s626_s16 }
   0x7   :  { %v34_v9 = vld [vmem:[%s1070_s0 + $0x30] sm:$0xff]  ;;  %v780_v10 = vld [vmem:[%s1071_s1 + $0x38] sm:$0xff]  ;;  %v40_v12 = vld [vmem:[%s1070_s0 + $0x60] sm:$0xff]  ;;  %v49_v33 = vand.u32 127, %v48_v32  ;;  %s624_s13 = sshll.u32 %s836_s12, 4  ;;  %s625_s13 = int_to_ptr.vmem [resolvable:$true] %s624_s13 }
   0x8   :  { %244 = vmatpush.bf16.msra.mxu0 %v780_v10  ;;  %v779_v11 = vld [vmem:[%s1071_s1 + $0x30] sm:$0xff]  ;;  %791 = vmatpush.bf16.msra.mxu3 %v780_v10  ;;  %v35_v13 = vld [vmem:[%s1070_s0 + $0x38] sm:$0xff]  ;;  %v778_v14 = vld [vmem:[%s1071_s1 + $0x28] sm:$0xff] }
   0x9   :  { %v41_v15 = vld [vmem:[%s1070_s0 + $0x68] sm:$0xff]  ;;  %v777_v16 = vld [vmem:[%s1071_s1 + $0x20] sm:$0xff]  ;;  %v42_v19 = vld [vmem:[%s1070_s0 + $0x70] sm:$0xff] }
   0xa   :  { %60 = vperm.xlu1 %803, %v31_v4   ;;  %54 = vperm.xlu0 %802, %v29_v5   ;;  %v37_v17 = vld [vmem:[%s1070_s0 + $0x48] sm:$0xff]  ;;  %v36_v18 = vld [vmem:[%s1070_s0 + $0x40] sm:$0xff]  ;;  %v43_v21 = vld [vmem:[%s1070_s0 + $0x78] sm:$0xff] }
   0xb   :  { %v44_v20 = vld [vmem:[%s1070_s0 + $0x80] sm:$0xff]  ;;  %v45_v22 = vld [vmem:[%s1070_s0 + $0x88] sm:$0xff]  ;;  %v47_v23 = vld [vmem:[%s1070_s0 + $0x98] sm:$0xff] }
   0xc   :  { %66 = vperm.xlu2 %804, %v33_v6   ;;  %245 = vmatpush.bf16.msra.mxu0 %v779_v11  ;;  %v46_v24 = vld [vmem:[%s1070_s0 + $0x90] sm:$0xff]  ;;  %v776_v25 = vld [vmem:[%s1071_s1 + $0x18] sm:$0xff]  ;;  %v774_v27 = vld [vmem:[%s1071_s1 + $0x8] sm:$0xff] }
   0xd   :  { %792 = vmatpush.bf16.msra.mxu3 %v779_v11  ;;  %v775_v26 = vld [vmem:[%s1071_s1 + $0x10] sm:$0xff]  ;;  %v773_v28 = vld [vmem:[%s1071_s1] sm:$0xff]  ;;  %v782_v52 = vld [vmem:[%s1072_s2 + $0x8] sm:$0xff] }
   0xe   :  { %378 = vmatpush.bf16.msra.mxu2 %v782_v52  ;;  %v781_v53 = vld [vmem:[%s1072_s2] sm:$0xff]  ;;  %v784_v55 = vld [vmem:[%s1072_s2 + $0x18] sm:$0xff]  ;;  %v783_v56 = vld [vmem:[%s1072_s2 + $0x10] sm:$0xff] }
   0xf   :  { %341 = vmatpush.bf16.msra.mxu1 %v784_v55  ;;  %v786_v59 = vld [vmem:[%s1072_s2 + $0x28] sm:$0xff]  ;;  %v785_v2 = vld [vmem:[%s1072_s2 + $0x20] sm:$0xff]  ;;  %v788_v11 = vld [vmem:[%s1072_s2 + $0x38] sm:$0xff] }
  0x10   :  { %246 = vmatpush.bf16.msra.mxu0 %v778_v14  ;;  %v790_v5 = vld [vmem:[%s1072_s2 + $0x48] sm:$0xff]  ;;  %v789_v6 = vld [vmem:[%s1072_s2 + $0x40] sm:$0xff]  ;;  %v578_v55 = vld [vmem:[%s1075_s5 + $0x30] sm:$0xff] }
  0x11   :  { %793 = vmatpush.bf16.msra.mxu3 %v778_v14 }
  0x12   :  { %84 = vperm.xlu1 %803, %v39_v7   ;;  %81 = vperm.xlu0 %802, %v38_v8  }
  0x13   :  { %379 = vmatpush.bf16.msra.mxu2 %v781_v53  ;;  %342 = vmatpush.bf16.msra.mxu1 %v783_v56 }
  0x14   :  { %69 = vperm.xlu2 %804, %v34_v9   ;;  %247 = vmatpush.bf16.msra.mxu0 %v777_v16 }
  0x15   :  { %794 = vmatpush.bf16.msra.mxu3 %v777_v16 }
  0x17   :  { %422 = vmatpush.bf16.msrb.mxu1 %v786_v59  ;;  %518 = vmatpush.bf16.msrb.mxu2 %v790_v5  ;;  %v577_v59 = vld [vmem:[%s1075_s5 + $0x28] sm:$0xff]  ;;  %v806_v5 = vld [vmem:[%s1074_s4] ss:$0 sm:$0xff] }
  0x18   :  { %248 = vmatpush.bf16.msra.mxu0 %v776_v25 }
  0x19   :  { %795 = vmatpush.bf16.msra.mxu3 %v776_v25 }
  0x1a   :  { %87 = vperm.xlu1 %803, %v40_v12   ;;  %72 = vperm.xlu0 %802, %v35_v13  }
  0x1b   :  { %423 = vmatpush.bf16.msrb.mxu1 %v785_v2  ;;  %519 = vmatpush.bf16.msrb.mxu2 %v789_v6 }
  0x1c   :  { %90 = vperm.xlu2 %804, %v41_v15   ;;  %249 = vmatpush.bf16.msra.mxu0 %v775_v26 }
  0x1d   :  { %796 = vmatpush.bf16.msra.mxu3 %v775_v26 }
  0x20   :  { %250 = vmatpush.bf16.msra.mxu0 %v774_v27 }
  0x21   :  { %797 = vmatpush.bf16.msra.mxu3 %v774_v27 }
  0x22   :  { %78 = vperm.xlu1 %803, %v37_v17   ;;  %75 = vperm.xlu0 %802, %v36_v18   ;;  %v787_v18 = vld [vmem:[%s1072_s2 + $0x30] sm:$0xff] }
  0x24   :  { %93 = vperm.xlu2 %804, %v42_v19   ;;  %251 = vmatpush.bf16.msra.mxu0 %v773_v28 }
  0x25   :  { %798 = vmatpush.bf16.msra.mxu3 %v773_v28 }
  0x2a   :  { %99 = vperm.xlu1 %803, %v44_v20   ;;  %96 = vperm.xlu0 %802, %v43_v21  }
  0x2c   :  { %102 = vperm.xlu2 %804, %v45_v22  }
  0x32   :  { %108 = vperm.xlu1 %803, %v47_v23   ;;  %105 = vperm.xlu0 %802, %v46_v24  }
  0x5e   :  { %v64_v29 = vpop.permute.xlu2 %63 }
  0x5f   :  { %vm114_vm12 = vcmp.eq.s32.totalorder %v64_v29, %v49_v33 }
  0x66   :  { %v67_v36 = vpop.permute.xlu2 %66 }
  0x67   :  { %vm115_vm13 = vcmp.eq.s32.totalorder %v67_v36, %v49_v33 }
  0x68   :  { %vm691_vm14 = vmpackc.low %vm115_vm13, %vm114_vm12 }
  0x6e   :  { %v70_v40 = vpop.permute.xlu2 %69 }
  0x74   :  { %v58_v30 = vpop.permute.xlu1 %57  ;;  %v52_v31 = vpop.permute.xlu0 %51 }
  0x75   :  { %vm110_vm1 = vcmp.eq.s32.totalorder %v52_v31, %v49_v33  ;;  %vm112_vm6 = vcmp.eq.s32.totalorder %v58_v30, %v49_v33 }
  0x76   :  { %v91_v43 = vpop.permute.xlu2 %90 }
  0x77   :  { %vm123_vm9 = vcmp.eq.s32.totalorder %v91_v43, %v49_v33  ;;  %v584_v43 = vld [vmem:[%s1075_s5 + $0x60] sm:$0xff] }
  0x7c   :  { %v61_v34 = vpop.permute.xlu1 %60  ;;  %v55_v35 = vpop.permute.xlu0 %54 }
  0x7d   :  { %vm111_vm0 = vcmp.eq.s32.totalorder %v55_v35, %v49_v33  ;;  %vm113_vm7 = vcmp.eq.s32.totalorder %v61_v34, %v49_v33 }
  0x7e   :  { %vm687_vm2 = vmpackc.low %vm111_vm0, %vm110_vm1  ;;  %v94_v46 = vpop.permute.xlu2 %93 }
  0x7f   :  { %688 = vmatmul.msk.bf16.vlgmr.msra.gmra.mxu0 %vm687_vm2, %v835_v37  ;;  %vm689_vm8 = vmpackc.low %vm113_vm7, %vm112_vm6  ;;  %vm124_vm0 = vcmp.eq.s32.totalorder %v94_v46, %v49_v33  ;;  %vm116_vm2 = vcmp.eq.s32.totalorder %v70_v40, %v49_v33  ;;  %v586_v40 = vld [vmem:[%s1075_s5 + $0x70] sm:$0xff] }
  0x80   :  { %v582_v46 = vld [vmem:[%s1075_s5 + $0x50] sm:$0xff] }
  0x84   :  { %v85_v38 = vpop.permute.xlu1 %84  ;;  %v82_v39 = vpop.permute.xlu0 %81 }
  0x85   :  { %vm121_vm3 = vcmp.eq.s32.totalorder %v85_v38, %v49_v33  ;;  %vm120_vm4 = vcmp.eq.s32.totalorder %v82_v39, %v49_v33  ;;  %v587_v39 = vld [vmem:[%s1075_s5 + $0x78] sm:$0xff] }
  0x86   :  { %vm697_vm5 = vmpackc.low %vm121_vm3, %vm120_vm4  ;;  %v103_v49 = vpop.permute.xlu2 %102 }
  0x87   :  { %698 = vmatmul.msk.bf16.vlgmr.msra.gmra.mxu3 %vm697_vm5, %v835_v37  ;;  %vm127_vm6 = vcmp.eq.s32.totalorder %v103_v49, %v49_v33  ;;  %v581_v49 = vld [vmem:[%s1075_s5 + $0x48] sm:$0xff] }
  0x8c   :  { %v73_v41 = vpop.permute.xlu0 %72  ;;  %v88_v42 = vpop.permute.xlu1 %87 }
  0x8d   :  { %vm122_vm10 = vcmp.eq.s32.totalorder %v88_v42, %v49_v33  ;;  %vm117_vm3 = vcmp.eq.s32.totalorder %v73_v41, %v49_v33  ;;  %v585_v42 = vld [vmem:[%s1075_s5 + $0x68] sm:$0xff] }
  0x8e   :  { %vm699_vm11 = vmpackc.low %vm123_vm9, %vm122_vm10 }
  0x8f   :  { %690 = vmatmul.msk.bf16.gmra.mxu0 %vm689_vm8, %v835_v37  ;;  %vm693_vm4 = vmpackc.low %vm117_vm3, %vm116_vm2  ;;  %vm617_vm2 = vcmask 58368  }
  0x94   :  { %v76_v44 = vpop.permute.xlu0 %75  ;;  %v79_v47 = vpop.permute.xlu1 %78 }
  0x95   :  { %vm119_vm8 = vcmp.eq.s32.totalorder %v79_v47, %v49_v33  ;;  %vm118_vm9 = vcmp.eq.s32.totalorder %v76_v44, %v49_v33 }
  0x96   :  { %vm695_vm10 = vmpackc.low %vm119_vm8, %vm118_vm9 }
  0x97   :  { %700 = vmatmul.msk.bf16.gmra.mxu3 %vm699_vm11, %v835_v37 }
  0x9c   :  { %v97_v45 = vpop.permute.xlu0 %96  ;;  %v100_v48 = vpop.permute.xlu1 %99 }
  0x9d   :  { %vm125_vm15 = vcmp.eq.s32.totalorder %v97_v45, %v49_v33  ;;  %vm126_vm5 = vcmp.eq.s32.totalorder %v100_v48, %v49_v33  ;;  %v583_v45 = vld [vmem:[%s1075_s5 + $0x58] sm:$0xff] }
  0x9e   :  { %vm701_vm1 = vmpackc.low %vm125_vm15, %vm124_vm0 }
  0x9f   :  { %692 = vmatmul.msk.bf16.gmra.mxu0 %vm691_vm14, %v835_v37  ;;  %vm703_vm7 = vmpackc.low %vm127_vm6, %vm126_vm5  ;;  %vm328_vm14 = vcmask 261120  }
  0xa4   :  { %v109_v50 = vpop.permute.xlu1 %108  ;;  %v106_v51 = vpop.permute.xlu0 %105 }
  0xa5   :  { %vm129_vm11 = vcmp.eq.s32.totalorder %v109_v50, %v49_v33  ;;  %vm128_vm12 = vcmp.eq.s32.totalorder %v106_v51, %v49_v33  ;;  %v580_v51 = vld [vmem:[%s1075_s5 + $0x40] sm:$0xff] }
  0xa6   :  { %vm705_vm13 = vmpackc.low %vm129_vm11, %vm128_vm12 }
  0xa7   :  { %702 = vmatmul.msk.bf16.gmra.mxu3 %vm701_vm1, %v835_v37  ;;  %vm594_vm1 = vcmask 1041409  }
  0xaf   :  { %694 = vmatmul.msk.bf16.gmra.mxu0 %vm693_vm4, %v835_v37 }
  0xb7   :  { %704 = vmatmul.msk.bf16.gmra.mxu3 %vm703_vm7, %v835_v37 }
  0xbf   :  { %696 = vmatmul.msk.bf16.gmra.mxu0 %vm695_vm10, %v835_v37 }
  0xc7   :  { %706 = vmatmul.msk.bf16.gmra.mxu3 %vm705_vm13, %v835_v37 }
  0xfc   :  { %v253_v54 = vpop.f32.mrf.mxu0 }
 0x104   :  { %v255_v57 = vpop.f32.mrf.mxu0 }
 0x105   :  { %v303_v58 = vpack.c.bf16 %v255_v57, %v253_v54  ;;  %v579_v54 = vld [vmem:[%s1075_s5 + $0x38] sm:$0xff] }
 0x107   :  { %729 = vmatmul.msk.bf16.vlgmr.msra.gmra.mxu2 %vm328_vm14, %v303_v58  ;;  %v805_v58 = vld [vmem:[%s1073_s3] ss:$0 sm:$0xff] }
 0x108   :  { %597 = vmatpush.msra.mxu2 %v587_v39 }
 0x10a   :  { %v278_v60 = vpop.f32.mrf.mxu3  ;;  %598 = vmatpush.msra.mxu2 %v586_v40 }
 0x10c   :  { %v258_v61 = vpop.f32.mrf.mxu0  ;;  %599 = vmatpush.msra.mxu2 %v585_v42 }
 0x10e   :  { %600 = vmatpush.msra.mxu2 %v584_v43 }
 0x110   :  { %601 = vmatpush.msra.mxu2 %v583_v45 }
 0x112   :  { %v280_v62 = vpop.f32.mrf.mxu3  ;;  %602 = vmatpush.msra.mxu2 %v582_v46 }
 0x113   :  { %v392_v63 = vpack.c.bf16 %v280_v62, %v278_v60 }
 0x114   :  { %v260_v0 = vpop.f32.mrf.mxu0  ;;  %603 = vmatpush.msra.mxu2 %v581_v49 }
 0x115   :  { %v304_v1 = vpack.c.bf16 %v260_v0, %v258_v61  ;;  %v576_v61 = vld [vmem:[%s1075_s5 + $0x20] sm:$0xff]  ;;  %v548_v0 = vshrl.u32 %v48_v32, 7 }
 0x116   :  { %604 = vmatpush.msra.mxu2 %v580_v51 }
 0x117   :  { %730 = vmatmul.msk.bf16.gmra.mxu2 %vm328_vm14, %v304_v1  ;;  %v549_v6 = vadd.s32 8, %v548_v0  ;;  %vm552_vm15 = vcmp.lt.s32.totalorder %v548_v0, %v806_v5 }
 0x118   :  { %605 = vmatpush.msra.mxu2 %v579_v54 }
 0x119   :  { %vm553_vm0 = vcmp.lt.s32.totalorder %v549_v6, %v806_v5 }
 0x11a   :  { %v283_v3 = vpop.f32.mrf.mxu3  ;;  %606 = vmatpush.msra.mxu2 %v578_v55 }
 0x11c   :  { %v263_v4 = vpop.f32.mrf.mxu0  ;;  %607 = vmatpush.msra.mxu2 %v577_v59 }
 0x11e   :  { %608 = vmatpush.msra.mxu2 %v576_v61 }
 0x122   :  { %v285_v7 = vpop.f32.mrf.mxu3 }
 0x123   :  { %v439_v8 = vpack.c.bf16 %v285_v7, %v283_v3 }
 0x124   :  { %v265_v9 = vpop.f32.mrf.mxu0 }
 0x125   :  { %v309_v10 = vpack.c.bf16 %v265_v9, %v263_v4  ;;  %v574_v4 = vld [vmem:[%s1075_s5 + $0x10] sm:$0xff] }
 0x127   :  { %719 = vmatmul.msk.bf16.vlgmr.msra.gmra.mxu1 %vm328_vm14, %v309_v10 }
 0x128   :  { %470 = vmatpush.bf16.msra.mxu1 %v788_v11  ;;  %v572_v11 = vld [vmem:[%s1075_s5] sm:$0xff] }
 0x12a   :  { %v288_v12 = vpop.f32.mrf.mxu3 }
 0x12c   :  { %v268_v13 = vpop.f32.mrf.mxu0  ;;  %471 = vmatpush.bf16.msra.mxu1 %v787_v18 }
 0x132   :  { %v290_v14 = vpop.f32.mrf.mxu3 }
 0x133   :  { %v440_v15 = vpack.c.bf16 %v290_v14, %v288_v12 }
 0x134   :  { %v270_v16 = vpop.f32.mrf.mxu0 }
 0x135   :  { %v310_v17 = vpack.c.bf16 %v270_v16, %v268_v13 }
 0x137   :  { %720 = vmatmul.msk.bf16.gmra.mxu1 %vm328_vm14, %v310_v17 }
 0x13a   :  { %v293_v19 = vpop.f32.mrf.mxu3 }
 0x13c   :  { %v273_v20 = vpop.f32.mrf.mxu0 }
 0x142   :  { %v295_v21 = vpop.f32.mrf.mxu3 }
 0x143   :  { %v487_v22 = vpack.c.bf16 %v295_v21, %v293_v19 }
 0x144   :  { %v275_v23 = vpop.f32.mrf.mxu0 }
 0x145   :  { %771 = vmatmul.msk.bf16.vlgmr.msrb.gmra.mxu2 %vm328_vm14, %v487_v22  ;;  %v391_v24 = vpack.c.bf16 %v275_v23, %v273_v20 }
 0x147   :  { %743 = vmatmul.msk.bf16.vlgmr.msrb.gmra.mxu1 %vm328_vm14, %v391_v24 }
 0x14a   :  { %v298_v25 = vpop.f32.mrf.mxu3 }
 0x152   :  { %v300_v26 = vpop.f32.mrf.mxu3 }
 0x153   :  { %v488_v27 = vpack.c.bf16 %v300_v26, %v298_v25 }
 0x155   :  { %772 = vmatmul.msk.bf16.gmra.mxu2 %vm328_vm14, %v488_v27 }
 0x157   :  { %744 = vmatmul.msk.bf16.gmra.mxu1 %vm328_vm14, %v392_v63  ;;  %v575_v63 = vld [vmem:[%s1075_s5 + $0x18] sm:$0xff] }
 0x158   :  { %609 = vmatpush.msra.mxu2 %v575_v63 }
 0x15a   :  { %610 = vmatpush.msra.mxu2 %v574_v4 }
 0x167   :  { %757 = vmatmul.msk.bf16.vlgmr.msra.gmra.mxu1 %vm328_vm14, %v439_v8  ;;  %v573_v8 = vld [vmem:[%s1075_s5 + $0x8] sm:$0xff] }
 0x168   :  { %611 = vmatpush.msra.mxu2 %v573_v8 }
 0x16a   :  { %612 = vmatpush.msra.mxu2 %v572_v11 }
 0x177   :  { %758 = vmatmul.msk.bf16.gmra.mxu1 %vm328_vm14, %v440_v15 }
 0x18a   :  { %v381_v31 = vpop.f32.mrf.mxu2 }
 0x192   :  { %v383_v34 = vpop.f32.mrf.mxu2 }
 0x19a   :  { %v386_v37 = vpop.f32.mrf.mxu2 }
 0x1a2   :  { %v388_v41 = vpop.f32.mrf.mxu2 }
 0x1a4   :  { %v344_v28 = vpop.f32.mrf.mxu1 }
 0x1a5   :  { %v382_v48 = vadd.f32 %v381_v31, %v344_v28 }
 0x1ac   :  { %v346_v29 = vpop.f32.mrf.mxu1 }
 0x1ad   :  { %v384_v56 = vadd.f32 %v383_v34, %v346_v29 }
 0x1b4   :  { %v349_v30 = vpop.f32.mrf.mxu1 }
 0x1b5   :  { %v387_v32 = vadd.f32 %v386_v37, %v349_v30 }
 0x1bc   :  { %v1002_v33 = vpop.f32.mrf.mxu1 }
 0x1bd   :  { %v389_v20 = vadd.f32 %v388_v41, %v1002_v33 }
 0x1c4   :  { %v425_v35 = vpop.f32.mrf.mxu1 }
 0x1c5   :  { %v435_v50 = vadd.f32 %v425_v35, %v382_v48  ;;  %v807_v48 = vld [vmem:[%s1076_s6] ss:$0 sm:$0xff] }
 0x1c8   :  { %v521_v47 = vpop.f32.mrf.mxu2 }
 0x1cc   :  { %v427_v36 = vpop.f32.mrf.mxu1 }
 0x1cd   :  { %v436_v62 = vadd.f32 %v427_v36, %v384_v56 }
 0x1d0   :  { %v523_v60 = vpop.f32.mrf.mxu2 }
 0x1d4   :  { %v430_v38 = vpop.f32.mrf.mxu1 }
 0x1d5   :  { %v437_v12 = vadd.f32 %v430_v38, %v387_v32 }
 0x1d8   :  { %v526_v14 = vpop.f32.mrf.mxu2 }
 0x1dc   :  { %v432_v44 = vpop.f32.mrf.mxu1 }
 0x1dd   :  { %v438_v22 = vadd.f32 %v432_v44, %v389_v20 }
 0x1e0   :  { %v528_v26 = vpop.f32.mrf.mxu2 }
 0x1e4   :  { %v473_v52 = vpop.f32.mrf.mxu1 }
 0x1e5   :  { %v483_v53 = vadd.f32 %v473_v52, %v435_v50 }
 0x1e7   :  { %v531_v57 = vadd.f32 %v521_v47, %v483_v53 }
 0x1e9   :  { %v539_v2 = vadd.f32 %v805_v58, %v531_v57 }
 0x1eb   :  { %v543_v9 = vmax.f32 %v539_v2, 0.0 }
 0x1ec   :  { %v475_v1 = vpop.f32.mrf.mxu1 }
 0x1ed   :  { %v484_v3 = vadd.f32 %v475_v1, %v436_v62  ;;  %v554_v16 = vsel %vm552_vm15, %v543_v9, 0.0 }
 0x1ef   :  { %v532_v7 = vadd.f32 %v523_v60, %v484_v3 }
 0x1f1   :  { %v540_v10 = vadd.f32 %v805_v58, %v532_v7 }
 0x1f3   :  { %v544_v13 = vmax.f32 %v540_v10, 0.0 }
 0x1f4   :  { %v478_v15 = vpop.f32.mrf.mxu1 }
 0x1f5   :  { %v555_v17 = vsel %vm553_vm0, %v544_v13, 0.0  ;;  %v485_v18 = vadd.f32 %v478_v15, %v437_v12 }
 0x1f6   :  { %v558_v19 = vmax.f32 %v554_v16, %v555_v17 }
 0x1f7   :  { %v533_v21 = vadd.f32 %v526_v14, %v485_v18 }
 0x1f8   :  { %v559_v27 = vrot.slane %v558_v19, 4 }
 0x1f9   :  { %v541_v24 = vadd.f32 %v805_v58, %v533_v21 }
 0x1fa   :  { %v560_v31 = vmax.f32 %v558_v19, %v559_v27 }
 0x1fb   :  { %v545_v29 = vmax.f32 %v541_v24, 0.0 }
 0x1fc   :  { %v480_v23 = vpop.f32.mrf.mxu1  ;;  %v561_v38 = vrot.slane %v560_v31, 2 }
 0x1fd   :  { %v486_v25 = vadd.f32 %v480_v23, %v438_v22  ;;  %v556_v35 = vsel %vm552_vm15, %v545_v29, 0.0 }
 0x1fe   :  { %v562_v40 = vmax.f32 %v560_v31, %v561_v38 }
 0x1ff   :  { %v534_v28 = vadd.f32 %v528_v26, %v486_v25 }
 0x200   :  { %v563_v42 = vrot.slane %v562_v40, 1 }
 0x201   :  { %v542_v30 = vadd.f32 %v805_v58, %v534_v28 }
 0x202   :  { %v564_v45 = vmax.f32 %v562_v40, %v563_v42 }
 0x203   :  { %v546_v34 = vmax.f32 %v542_v30, 0.0 }
 0x205   :  { %v557_v36 = vsel %vm553_vm0, %v546_v34, 0.0 }
 0x206   :  { %v565_v37 = vmax.f32 %v556_v35, %v557_v36 }
 0x208   :  { %v566_v39 = vrot.slane %v565_v37, 4 }
 0x20a   :  { %v567_v33 = vmax.f32 %v565_v37, %v566_v39 }
 0x20c   :  { %v568_v41 = vrot.slane %v567_v33, 2 }
 0x20e   :  { %v569_v43 = vmax.f32 %v567_v33, %v568_v41 }
 0x210   :  { %v570_v44 = vrot.slane %v569_v43, 1 }
 0x212   :  { %v571_v46 = vmax.f32 %v569_v43, %v570_v44 }
 0x214   :  { %v595_v47 = vsel %vm594_vm1, %v571_v46, %v564_v45 }
 0x215   :  { %613 = vmatmul.f32.vlgmr.msra.gmra.mxu2 %v595_v47 }
 0x298   :  { %v614_v49 = vpop.f32.mrf.mxu2 }
 0x299   :  { %v615_v50 = vadd.f32 %v807_v48, %v614_v49 }
 0x29b   :  { %618 = vst.msk [vmem:[#allocation2] sm:$0x3] %vm617_vm2, %v615_v50 }
 0x29c   :  { %629 = dma.vmem_to_hbm [thread:$0]  %s625_s13, 32, %s627_s16, [#allocation3]  }
 0x29d   :  { %832 = dma.done.wait [#allocation3], 32  }
 0x29e   :  { %833 = vsyncadd [#allocation3], 4294967264 }
 0x29f   :  { %634 = vsyncpa [#allocation3], 1 }

</bundles_post_ra>
